<compile_context>
chip_gen: v6e
topology: v6e:2x2x1
jax: 0.10.0
libtpu: 0.0.40
codegen_flags: <defaults>
</compile_context>

<pallas_src>
import functools

import jax
import jax.numpy as jnp
from jax.experimental import pallas as pl
from jax.experimental.pallas import tpu as pltpu


def _mul_conv1x1_kernel(s_ref, w_ref, x_ref, o_ref):
    """One Cout block of the fused (x * s) -> 1x1 conv.

    s_ref: [1, Cin]        f32   per-input-channel scale (from x174)
    w_ref: [Cout_blk, Cin] bf16  1x1 conv weight (pre-cast at init)
    x_ref: [Cin, HW]       f32   activation
    o_ref: [Cout_blk, HW]  f32
    """
    # Fold the per-channel scale into the weight: sublane broadcast of the
    # [1, Cin] row over W's rows.  Multiply in bf16 (native VALU on v6e/v7x;
    # on v5e the compiler widens internally, equivalent to the old f32 path).
    ws = w_ref[...] * s_ref[...].astype(jnp.bfloat16)
    xb = x_ref[...].astype(jnp.bfloat16)
    # 1x1 conv == matmul on the MXU, f32 accumulation.
    o_ref[...] = jnp.dot(
        ws, xb, preferred_element_type=jnp.float32
    ).astype(o_ref.dtype)


def prepare_conv_weight(weight):
    """One-time weight prep: [Cout, Cin, 1, 1] f32 -> [Cout, Cin] bf16.

    Hoists the f32->bf16 cast out of the per-call path (the weight is a model
    constant), removing ~0.9 MB of per-call HBM traffic and one XLA dispatch.
    """
    cout, cin = weight.shape[0], weight.shape[1]
    return jnp.asarray(weight).reshape(cout, cin).astype(jnp.bfloat16)


def _num_cout_blocks():
    """2-way Cout split on v7x (2 TensorCores / chip); 1 elsewhere."""
    try:
        kind = jax.devices()[0].device_kind.lower()
    except Exception:
        return 1
    return 2 if "v7" in kind else 1


@functools.partial(jax.jit, static_argnames=("cout_blocks",))
def mul_conv1x1(x174, x169, w_bf16, *, cout_blocks=1):
    """x174: [1, Cin, 1, 1] f32, x169: [1, Cin, H, W] f32, w_bf16: [Cout, Cin] bf16."""
    n, cin, h, w = x169.shape
    cout = w_bf16.shape[0]
    assert n == 1, "module is defined for batch 1"
    hw = h * w

    # Guard the Cout split (must keep sublane alignment of the weight block).
    if cout % cout_blocks != 0 or (cout // cout_blocks) % 8 != 0:
        cout_blocks = 1
    cb = cout // cout_blocks

    # Free reshapes: NCHW with N=1 is already channel-major; weight keeps its
    # native [Cout, Cin] layout.
    x_mat = x169.reshape(cin, hw)   # [Cin, HW]
    s_row = x174.reshape(1, cin)    # [1, Cin]

    bytes_accessed = (
        x_mat.size * 4 + s_row.size * 4 + w_bf16.size * 2 + cout * hw * 4
    )

    out_mat = pl.pallas_call(
        _mul_conv1x1_kernel,
        out_shape=jax.ShapeDtypeStruct((cout, hw), x169.dtype),
        grid=(cout_blocks,),
        in_specs=[
            pl.BlockSpec((1, cin), lambda i: (0, 0)),    # s: replicated
            pl.BlockSpec((cb, cin), lambda i: (i, 0)),   # W: split over Cout
            pl.BlockSpec((cin, hw), lambda i: (0, 0)),   # X: replicated
        ],
        out_specs=pl.BlockSpec((cb, hw), lambda i: (i, 0)),
        compiler_params=pltpu.CompilerParams(
            dimension_semantics=("parallel",),
        ),
        cost_estimate=pl.CostEstimate(
            flops=2 * cout * cin * hw + cout * cin,
            transcendentals=0,
            bytes_accessed=bytes_accessed,
        ),
    )(s_row, w_bf16, x_mat)

    # [Cout, HW] -> NCHW [1, Cout, H, W] is a free reshape.
    return out_mat.reshape(1, cout, h, w)


if __name__ == "__main__":
    key = jax.random.PRNGKey(0)
    k1, k2, k3 = jax.random.split(key, 3)

    N, CIN, H, W, COUT = 1, 960, 7, 7, 160
    x169 = jax.random.normal(k1, (N, CIN, H, W), dtype=jnp.float32)
    x174 = jax.random.normal(k2, (N, CIN, 1, 1), dtype=jnp.float32)
    # Deterministic synthetic weight for Conv2d(960, 160, 1, bias=False).
    weight = jax.random.normal(k3, (COUT, CIN, 1, 1), dtype=jnp.float32) * 0.02

    # One-time weight preparation (model init, not per call).
    w_bf16 = jax.block_until_ready(prepare_conv_weight(weight))

    cout_blocks = _num_cout_blocks()
    out = mul_conv1x1(x174, x169, w_bf16, cout_blocks=cout_blocks)
    jax.block_until_ready(out)

    # Reference (plain JAX, f32): broadcast mul + 1x1 conv as einsum.
    ref = jnp.einsum("nchw,oc->nohw", x169 * x174, weight.reshape(COUT, CIN))
    assert out.shape == (N, COUT, H, W)
    # Tolerance loosened for bf16 weight / bf16 MXU operands (f32 accumulate).
    assert jnp.allclose(out, ref, atol=2e-2, rtol=2e-2)

    print("KERNEL_OK")
</pallas_src>

<mosaic_0001>
module attributes {stable_mosaic.version = 11 : i64} {
  func.func @_mul_conv1x1_kernel(%arg0: i32, %arg1: memref<1x960xf32, #tpu.memory_space<vmem>>, %arg2: memref<160x960xbf16, #tpu.memory_space<vmem>>, %arg3: memref<960x49xf32, #tpu.memory_space<vmem>>, %arg4: memref<160x49xf32, #tpu.memory_space<vmem>>) attributes {dimension_semantics = [#tpu.dimension_semantics<parallel>], iteration_bounds = array<i64: 1>, scalar_prefetch = 0 : i64, scratch_operands = 0 : i64, tpu.core_type = #tpu.core_type<tc>, window_params = [{pipeline_mode = #tpu.pipeline_mode<synchronous>, transform_indices = @transform_0, window_bounds = array<i64: 1, 960>}, {transform_indices = @transform_1, window_bounds = array<i64: 160, 960>}, {pipeline_mode = #tpu.pipeline_mode<synchronous>, transform_indices = @transform_2, window_bounds = array<i64: 960, 49>}, {transform_indices = @transform_3, window_bounds = array<i64: 160, 49>}]} {
    %c0 = arith.constant 0 : index
    %c0_0 = arith.constant 0 : index
    %0 = vector.load %arg2[%c0, %c0_0] : memref<160x960xbf16, #tpu.memory_space<vmem>>, vector<160x960xbf16>
    %c0_1 = arith.constant 0 : index
    %c0_2 = arith.constant 0 : index
    %1 = vector.load %arg1[%c0_1, %c0_2] : memref<1x960xf32, #tpu.memory_space<vmem>>, vector<1x960xf32>
    %2 = arith.truncf %1 : vector<1x960xf32> to vector<1x960xbf16>
    %3 = vector.broadcast %2 : vector<1x960xbf16> to vector<160x960xbf16>
    %4 = arith.mulf %0, %3 : vector<160x960xbf16>
    %c0_3 = arith.constant 0 : index
    %c0_4 = arith.constant 0 : index
    %5 = vector.load %arg3[%c0_3, %c0_4] : memref<960x49xf32, #tpu.memory_space<vmem>>, vector<960x49xf32>
    %6 = arith.truncf %5 : vector<960x49xf32> to vector<960x49xbf16>
    %cst = arith.constant dense<0.000000e+00> : vector<160x49xf32>
    %7 = tpu.matmul %4, %6, %cst {dimension_numbers = #tpu.dot_dimension_numbers<[1], [0], [0], [1], [0, 0, 1, 1], [], []>} : vector<160x960xbf16>, vector<960x49xbf16>, vector<160x49xf32> -> vector<160x49xf32>
    %c0_5 = arith.constant 0 : index
    %c0_6 = arith.constant 0 : index
    %8 = vector.load %arg4[%c0_5, %c0_6] : memref<160x49xf32, #tpu.memory_space<vmem>>, vector<160x49xf32>
    tpu.vector_store %arg4[%c0_5, %c0_6], %7 {strides = array<i32>} : memref<160x49xf32, #tpu.memory_space<vmem>>, vector<160x49xf32>,
    return
  }
  func.func @transform_0(%arg0: i32) -> (i32, i32) {
    %c0_i32 = arith.constant 0 : i32
    %c0_i32_0 = arith.constant 0 : i32
    %c0_i32_1 = arith.constant 0 : i32
    return %c0_i32, %c0_i32_0 : i32, i32
  }
  func.func @transform_1(%arg0: i32) -> (i32, i32) {
    %c0_i32 = arith.constant 0 : i32
    %c0_i32_0 = arith.constant 0 : i32
    return %arg0, %c0_i32 : i32, i32
  }
  func.func @transform_2(%arg0: i32) -> (i32, i32) {
    %c0_i32 = arith.constant 0 : i32
    %c0_i32_0 = arith.constant 0 : i32
    %c0_i32_1 = arith.constant 0 : i32
    return %c0_i32, %c0_i32_0 : i32, i32
  }
  func.func @transform_3(%arg0: i32) -> (i32, i32) {
    %c0_i32 = arith.constant 0 : i32
    %c0_i32_0 = arith.constant 0 : i32
    return %arg0, %c0_i32 : i32, i32
  }
}

</mosaic_0001>

<bundles_post_ra>
// kernel: mul_conv1x1.1
= control target key start
LH: loop header
LB: loop body
LE: loop exit
PB: predicated region body
PF: predicated region fallthrough
CT: control target
= control target key end

     0   :  { %v97_v47 = vlaneseq  ;;  %vm875_vm0 = vcmask 523264   ;;  %vm1358_vm1 = vcmask 400384   ;;  %s3252_s2 = inlined_call_operand.vmem [shape: f32[960,49], index: 2, kind: input, shape index: {}]   ;;  %s3253_s0 = inlined_call_operand.vmem [shape: f32[1,960], index: 0, kind: input, shape index: {}]   ;;  %s3254_s1 = inlined_call_operand.vmem [shape: bf16[160,960], index: 1, kind: input, shape index: {}]   ;;  %s3255_s3 = inlined_call_operand.vmem [shape: f32[160,49], index: 3, kind: output, shape index: {}]  }
   0x1   :  { %v335_v0 = vld [vmem:[%s3252_s2 + $0xf0] sm:$0xff]  ;;  %v336_v1 = vld [vmem:[%s3252_s2 + $0xf8] sm:$0xff]  ;;  %v333_v11 = vld [vmem:[%s3252_s2 + $0xe0] sm:$0xff] }
   0x2   :  { %v367_v2 = vld [vmem:[%s3252_s2 + $0x1f0] sm:$0xff]  ;;  %v440_v3 = vpack.c.bf16 %v336_v1, %v335_v0  ;;  %v368_v4 = vld [vmem:[%s3252_s2 + $0x1f8] sm:$0xff]  ;;  %v334_v13 = vld [vmem:[%s3252_s2 + $0xe8] sm:$0xff]  ;;  %v1853_v61 = vshrl.u32 %v97_v47, 7 }
   0x3   :  { %v319_v5 = vld [vmem:[%s3252_s2 + $0x70] sm:$0xff]  ;;  %v320_v6 = vld [vmem:[%s3252_s2 + $0x78] sm:$0xff]  ;;  %v456_v7 = vpack.c.bf16 %v368_v4, %v367_v2  ;;  %v365_v14 = vld [vmem:[%s3252_s2 + $0x1e0] sm:$0xff]  ;;  %v439_v16 = vpack.c.bf16 %v334_v13, %v333_v11 }
   0x4   :  { %v432_v8 = vpack.c.bf16 %v320_v6, %v319_v5  ;;  %v351_v9 = vld [vmem:[%s3252_s2 + $0x170] sm:$0xff]  ;;  %v352_v10 = vld [vmem:[%s3252_s2 + $0x178] sm:$0xff]  ;;  %1477 = vmatprep.subr.bf16.mxu0 %v440_v3  ;;  %v366_v15 = vld [vmem:[%s3252_s2 + $0x1e8] sm:$0xff]  ;;  %v1889_v13 = vsub.s32 0, %v1853_v61 }
   0x5   :  { %v448_v12 = vpack.c.bf16 %v352_v10, %v351_v9  ;;  %1553 = vmatprep.subr.bf16.mxu1 %v456_v7  ;;  %v455_v17 = vpack.c.bf16 %v366_v15, %v365_v14  ;;  %v317_v18 = vld [vmem:[%s3252_s2 + $0x60] sm:$0xff]  ;;  %v318_v19 = vld [vmem:[%s3252_s2 + $0x68] sm:$0xff]  ;;  %v331_v23 = vld [vmem:[%s3252_s2 + $0xd0] sm:$0xff] }
   0x6   :  { %1478 = vmatpush3.bf16.msra.mxu0 %v432_v8  ;;  %v349_v20 = vld [vmem:[%s3252_s2 + $0x160] sm:$0xff]  ;;  %v431_v21 = vpack.c.bf16 %v318_v19, %v317_v18  ;;  %v350_v22 = vld [vmem:[%s3252_s2 + $0x168] sm:$0xff]  ;;  %v332_v24 = vld [vmem:[%s3252_s2 + $0xd8] sm:$0xff]  ;;  %v107_v18 = vsub.s32 2, %v1853_v61  ;;  %v111_v19 = vsub.s32 3, %v1853_v61 }
   0x7   :  { %1554 = vmatpush3.bf16.msra.mxu1 %v448_v12  ;;  %1479 = vmatprep.subr.bf16.mxu0 %v439_v16  ;;  %v447_v25 = vpack.c.bf16 %v350_v22, %v349_v20  ;;  %v438_v26 = vpack.c.bf16 %v332_v24, %v331_v23  ;;  %v363_v27 = vld [vmem:[%s3252_s2 + $0x1d0] sm:$0xff]  ;;  %v364_v28 = vld [vmem:[%s3252_s2 + $0x1d8] sm:$0xff]  ;;  %v329_v35 = vld [vmem:[%s3252_s2 + $0xc0] sm:$0xff]  ;;  %v119_v22 = vsub.s32 5, %v1853_v61  ;;  %v123_v23 = vsub.s32 6, %v1853_v61 }
   0x8   :  { %1555 = vmatprep.subr.bf16.mxu1 %v455_v17  ;;  %v315_v29 = vld [vmem:[%s3252_s2 + $0x50] sm:$0xff]  ;;  %v454_v30 = vpack.c.bf16 %v364_v28, %v363_v27  ;;  %v316_v31 = vld [vmem:[%s3252_s2 + $0x58] sm:$0xff]  ;;  %v330_v36 = vld [vmem:[%s3252_s2 + $0xc8] sm:$0xff]  ;;  %v103_v17 = vsub.s32 1, %v1853_v61 }
   0x9   :  { %v347_v32 = vld [vmem:[%s3252_s2 + $0x150] sm:$0xff]  ;;  %v348_v33 = vld [vmem:[%s3252_s2 + $0x158] sm:$0xff]  ;;  %v430_v34 = vpack.c.bf16 %v316_v31, %v315_v29  ;;  %v361_v37 = vld [vmem:[%s3252_s2 + $0x1c0] sm:$0xff]  ;;  %v437_v39 = vpack.c.bf16 %v330_v36, %v329_v35 }
   0xa   :  { %1480 = vmatpush3.bf16.msra.mxu0 %v431_v21  ;;  %v446_v38 = vpack.c.bf16 %v348_v33, %v347_v32  ;;  %v362_v40 = vld [vmem:[%s3252_s2 + $0x1c8] sm:$0xff]  ;;  %v313_v41 = vld [vmem:[%s3252_s2 + $0x40] sm:$0xff]  ;;  %v327_v46 = vld [vmem:[%s3252_s2 + $0xb0] sm:$0xff]  ;;  %v115_v21 = vsub.s32 4, %v1853_v61 }
   0xb   :  { %1556 = vmatpush3.bf16.msra.mxu1 %v447_v25  ;;  %1481 = vmatprep.subr.bf16.mxu0 %v438_v26  ;;  %v314_v42 = vld [vmem:[%s3252_s2 + $0x48] sm:$0xff]  ;;  %v453_v43 = vpack.c.bf16 %v362_v40, %v361_v37  ;;  %v345_v44 = vld [vmem:[%s3252_s2 + $0x140] sm:$0xff]  ;;  %v328_v48 = vld [vmem:[%s3252_s2 + $0xb8] sm:$0xff] }
   0xc   :  { %1557 = vmatprep.subr.bf16.mxu1 %v454_v30  ;;  %v346_v45 = vld [vmem:[%s3252_s2 + $0x148] sm:$0xff]  ;;  %v359_v49 = vld [vmem:[%s3252_s2 + $0x1b0] sm:$0xff]  ;;  %v360_v50 = vld [vmem:[%s3252_s2 + $0x1b8] sm:$0xff]  ;;  %v429_v51 = vpack.c.bf16 %v314_v42, %v313_v41  ;;  %v436_v53 = vpack.c.bf16 %v328_v48, %v327_v46 }
   0xd   :  { %v445_v52 = vpack.c.bf16 %v346_v45, %v345_v44  ;;  %v311_v54 = vld [vmem:[%s3252_s2 + $0x30] sm:$0xff]  ;;  %v312_v55 = vld [vmem:[%s3252_s2 + $0x38] sm:$0xff]  ;;  %v452_v57 = vpack.c.bf16 %v360_v50, %v359_v49  ;;  %v325_v59 = vld [vmem:[%s3252_s2 + $0xa0] sm:$0xff] }
   0xe   :  { %1482 = vmatpush3.bf16.msra.mxu0 %v430_v34  ;;  %v343_v56 = vld [vmem:[%s3252_s2 + $0x130] sm:$0xff]  ;;  %v344_v58 = vld [vmem:[%s3252_s2 + $0x138] sm:$0xff]  ;;  %v326_v60 = vld [vmem:[%s3252_s2 + $0xa8] sm:$0xff]  ;;  %v428_v0 = vpack.c.bf16 %v312_v55, %v311_v54 }
   0xf   :  { %1558 = vmatpush3.bf16.msra.mxu1 %v446_v38  ;;  %1483 = vmatprep.subr.bf16.mxu0 %v437_v39  ;;  %v357_v62 = vld [vmem:[%s3252_s2 + $0x1a0] sm:$0xff]  ;;  %v358_v63 = vld [vmem:[%s3252_s2 + $0x1a8] sm:$0xff]  ;;  %v444_v4 = vpack.c.bf16 %v344_v58, %v343_v56  ;;  %v435_v5 = vpack.c.bf16 %v326_v60, %v325_v59  ;;  %v323_v7 = vld [vmem:[%s3252_s2 + $0x90] sm:$0xff] }
  0x10   :  { %1559 = vmatprep.subr.bf16.mxu1 %v453_v43  ;;  %v309_v1 = vld [vmem:[%s3252_s2 + $0x20] sm:$0xff]  ;;  %v310_v2 = vld [vmem:[%s3252_s2 + $0x28] sm:$0xff]  ;;  %v324_v8 = vld [vmem:[%s3252_s2 + $0x98] sm:$0xff]  ;;  %v451_v9 = vpack.c.bf16 %v358_v63, %v357_v62 }
  0x11   :  { %v341_v3 = vld [vmem:[%s3252_s2 + $0x120] sm:$0xff]  ;;  %v342_v6 = vld [vmem:[%s3252_s2 + $0x128] sm:$0xff]  ;;  %v355_v10 = vld [vmem:[%s3252_s2 + $0x190] sm:$0xff]  ;;  %v427_v20 = vpack.c.bf16 %v310_v2, %v309_v1  ;;  %v434_v25 = vpack.c.bf16 %v324_v8, %v323_v7 }
  0x12   :  { %1484 = vmatpush3.bf16.msra.mxu0 %v429_v51  ;;  %v356_v11 = vld [vmem:[%s3252_s2 + $0x198] sm:$0xff]  ;;  %v307_v12 = vld [vmem:[%s3252_s2 + $0x10] sm:$0xff]  ;;  %v443_v24 = vpack.c.bf16 %v342_v6, %v341_v3  ;;  %v321_v26 = vld [vmem:[%s3252_s2 + $0x80] sm:$0xff]  ;;  %v127_v51 = vsub.s32 7, %v1853_v61 }
  0x13   :  { %1560 = vmatpush3.bf16.msra.mxu1 %v445_v52  ;;  %1485 = vmatprep.subr.bf16.mxu0 %v436_v53  ;;  %v308_v14 = vld [vmem:[%s3252_s2 + $0x18] sm:$0xff]  ;;  %v339_v15 = vld [vmem:[%s3252_s2 + $0x110] sm:$0xff]  ;;  %v322_v27 = vld [vmem:[%s3252_s2 + $0x88] sm:$0xff]  ;;  %v450_v28 = vpack.c.bf16 %v356_v11, %v355_v10 }
  0x14   :  { %1561 = vmatprep.subr.bf16.mxu1 %v452_v57  ;;  %v340_v16 = vld [vmem:[%s3252_s2 + $0x118] sm:$0xff]  ;;  %v426_v29 = vpack.c.bf16 %v308_v14, %v307_v12  ;;  %v95_v31 = vld [vmem:[%s3253_s0] sm:$0xff]  ;;  %v354_v33 = vld [vmem:[%s3252_s2 + $0x188] sm:$0xff]  ;;  %v433_v38 = vpack.c.bf16 %v322_v27, %v321_v26 }
  0x15   :  { %v442_v30 = vpack.c.bf16 %v340_v16, %v339_v15  ;;  %v353_v32 = vld [vmem:[%s3252_s2 + $0x180] sm:$0xff]  ;;  %v100_v34 = vrot.slane %v95_v31, %v1889_v13  ;;  %v104_v35 = vrot.slane %v95_v31, %v103_v17  ;;  %v108_v36 = vrot.slane %v95_v31, %v107_v18  ;;  %v306_v40 = vld [vmem:[%s3252_s2 + $0x8] sm:$0xff]  ;;  %v399_v49 = vld [vmem:[%s3252_s2 + $0x2f0] sm:$0xff] }
  0x16   :  { %1486 = vmatpush3.bf16.msra.mxu0 %v428_v0  ;;  %v112_v37 = vrot.slane %v95_v31, %v111_v19  ;;  %v305_v39 = vld [vmem:[%s3252_s2] sm:$0xff]  ;;  %v116_v42 = vrot.slane %v95_v31, %v115_v21  ;;  %v120_v43 = vrot.slane %v95_v31, %v119_v22  ;;  %v1931_v44 = vrot.slane %v95_v31, %v123_v23  ;;  %v338_v45 = vld [vmem:[%s3252_s2 + $0x108] sm:$0xff]  ;;  %v400_v50 = vld [vmem:[%s3252_s2 + $0x2f8] sm:$0xff] }
  0x17   :  { %1562 = vmatpush3.bf16.msra.mxu1 %v444_v4  ;;  %1487 = vmatprep.subr.bf16.mxu0 %v435_v5  ;;  %v337_v41 = vld [vmem:[%s3252_s2 + $0x100] sm:$0xff]  ;;  %v137_v46 = vpack.c.bf16 %v100_v34, %v100_v34  ;;  %v138_v47 = vpack.c.bf16 %v104_v35, %v104_v35  ;;  %v139_v48 = vpack.c.bf16 %v108_v36, %v108_v36  ;;  %v16_v4 = vld [vmem:[%s3254_s1 + $0x8] sm:$0xff]  ;;  %v383_v8 = vld [vmem:[%s3252_s2 + $0x270] sm:$0xff] }
  0x18   :  { %1563 = vmatprep.subr.bf16.mxu1 %v451_v9  ;;  %v449_v52 = vpack.c.bf16 %v354_v33, %v353_v32  ;;  %v140_v53 = vpack.c.bf16 %v112_v37, %v112_v37  ;;  %v141_v54 = vpack.c.bf16 %v116_v42, %v116_v42  ;;  %v142_v55 = vpack.c.bf16 %v120_v43, %v120_v43  ;;  %v15_v61 = vld [vmem:[%s3254_s1] sm:$0xff]  ;;  %v20_v6 = vld [vmem:[%s3254_s1 + $0x28] sm:$0xff]  ;;  %v384_v14 = vld [vmem:[%s3252_s2 + $0x278] sm:$0xff] }
  0x19   :  { %v425_v56 = vpack.c.bf16 %v306_v40, %v305_v39  ;;  %v146_v57 = vpack.i.b16 %v137_v46, %v137_v46  ;;  %v153_v58 = vpack.i.b16 %v138_v47, %v138_v47  ;;  %v160_v59 = vpack.i.b16 %v139_v48, %v139_v48  ;;  %v19_v1 = vld [vmem:[%s3254_s1 + $0x20] sm:$0xff]  ;;  %v24_v16 = vld [vmem:[%s3254_s1 + $0x48] sm:$0xff]  ;;  %v416_v21 = vld [vmem:[%s3252_s2 + $0x378] sm:$0xff] }
  0x1a   :  { %1488 = vmatpush3.bf16.msra.mxu0 %v427_v20  ;;  %v441_v60 = vpack.c.bf16 %v338_v45, %v337_v41  ;;  %v167_v62 = vpack.i.b16 %v140_v53, %v140_v53  ;;  %v472_v63 = vpack.c.bf16 %v400_v50, %v399_v49  ;;  %v174_v0 = vpack.i.b16 %v141_v54, %v141_v54  ;;  %v23_v9 = vld [vmem:[%s3254_s1 + $0x40] sm:$0xff]  ;;  %v28_v19 = vld [vmem:[%s3254_s1 + $0x68] sm:$0xff]  ;;  %v415_v20 = vld [vmem:[%s3252_s2 + $0x370] sm:$0xff] }
  0x1b   :  { %1564 = vmatpush3.bf16.msra.mxu1 %v443_v24  ;;  %1489 = vmatprep.subr.bf16.mxu0 %v434_v25  ;;  %v151_v2 = vrot.slane %v146_v57, %v1889_v13  ;;  %v158_v3 = vrot.slane %v153_v58, %v1889_v13  ;;  %v165_v5 = vrot.slane %v160_v59, %v1889_v13  ;;  %v27_v15 = vld [vmem:[%s3254_s1 + $0x60] sm:$0xff]  ;;  %v398_v27 = vld [vmem:[%s3252_s2 + $0x2e8] sm:$0xff]  ;;  %v2042_v42 = vld [vmem:[%s3252_s2 + $0x2d0] sm:$0xff] }
  0x1c   :  { %1565 = vmatprep.subr.bf16.mxu1 %v450_v28  ;;  %v172_v7 = vrot.slane %v167_v62, %v1889_v13  ;;  %v1966_v10 = vrot.slane %v174_v0, %v1889_v13  ;;  %v181_v11 = vpack.i.b16 %v142_v55, %v142_v55  ;;  %v1979_v17 = vrot.slane %v95_v31, %v127_v51  ;;  %v397_v26 = vld [vmem:[%s3252_s2 + $0x2e0] sm:$0xff]  ;;  %v382_v34 = vld [vmem:[%s3252_s2 + $0x268] sm:$0xff]  ;;  %v396_v43 = vld [vmem:[%s3252_s2 + $0x2d8] sm:$0xff] }
  0x1d   :  { %v1968_v12 = vcombine.low %v151_v2, %v158_v3  ;;  %v2009_v28 = vld [vmem:[%s3252_s2 + $0x260] sm:$0xff]  ;;  %v3256_v31 = vmov 0   ;;  %v2031_v36 = vld [vmem:[%s3252_s2 + $0x368] sm:$0xff]  ;;  %v464_v39 = vpack.c.bf16 %v384_v14, %v383_v8  ;;  %v471_v53 = vpack.c.bf16 %v398_v27, %v397_v26  ;;  %v2063_v54 = vld [vmem:[%s3252_s2 + $0x250] sm:$0xff] }
  0x1e   :  { %1490 = vmatpush3.bf16.msra.mxu0 %v426_v29  ;;  %v1981_v18 = vcombine.low %v165_v5, %v172_v7  ;;  %v1993_v22 = vrot.slane %v181_v11, %v1889_v13  ;;  %v2026_v35 = vld [vmem:[%s3252_s2 + $0x360] sm:$0xff]  ;;  %v32_v49 = vld [vmem:[%s3254_s1 + $0x88] sm:$0xff]  ;;  %v463_v57 = vpack.c.bf16 %v382_v34, %v2009_v28  ;;  %v470_v59 = vpack.c.bf16 %v396_v43, %v2042_v42  ;;  %v2083_v62 = vld [vmem:[%s3252_s2 + $0x350] sm:$0xff] }
  0x1f   :  { %1566 = vmatpush3.bf16.msra.mxu1 %v442_v30  ;;  %1491 = vmatprep.subr.bf16.mxu0 %v433_v38  ;;  %v225_v23 = vmul.bf16 %v1968_v12, %v15_v61  ;;  %v229_v24 = vmul.bf16 %v1968_v12, %v19_v1  ;;  %v1998_v25 = vmul.bf16 %v1968_v12, %v23_v9  ;;  %v31_v41 = vld [vmem:[%s3254_s1 + $0x80] sm:$0xff]  ;;  %v36_v50 = vld [vmem:[%s3254_s1 + $0xa8] sm:$0xff] }
  0x20   :  { %1567 = vmatprep.subr.bf16.mxu1 %v449_v52  ;;  %v226_v29 = vmul.bf16 %v1981_v18, %v16_v4  ;;  %v230_v30 = vmul.bf16 %v1981_v18, %v20_v6  ;;  %v2015_v32 = vmul.bf16 %v1968_v12, %v27_v15  ;;  %v2018_v33 = vmul.bf16 %v1981_v18, %v24_v16  ;;  %v35_v48 = vld [vmem:[%s3254_s1 + $0xa0] sm:$0xff]  ;;  %v40_v2 = vld [vmem:[%s3254_s1 + $0xc8] sm:$0xff] }
  0x21   :  { %v1388_v37 = vcombine.high %v225_v23, %v229_v24  ;;  %v1387_v38 = vcombine.low %v225_v23, %v229_v24  ;;  %v2034_v40 = vmul.bf16 %v1981_v18, %v28_v19  ;;  %v480_v52 = vpack.c.bf16 %v416_v21, %v415_v20  ;;  %v39_v55 = vld [vmem:[%s3254_s1 + $0xc0] sm:$0xff]  ;;  %v44_v3 = vld [vmem:[%s3254_s1 + $0xe8] sm:$0xff] }
  0x22   :  { %1492 = vmatpush3.bf16.msra.mxu0 %v425_v56  ;;  %v1390_v45 = vcombine.high %v226_v29, %v230_v30  ;;  %v1389_v46 = vcombine.low %v226_v29, %v230_v30  ;;  %v1396_v47 = vcombine.high %v1998_v25, %v2015_v32  ;;  %v43_v56 = vld [vmem:[%s3254_s1 + $0xe0] sm:$0xff]  ;;  %v479_v58 = vpack.c.bf16 %v2031_v36, %v2026_v35  ;;  %v2132_v15 = vld [vmem:[%s3252_s2 + $0x348] sm:$0xff] }
  0x23   :  { %1568 = vmatpush3.bf16.msra.mxu1 %v441_v60  ;;  %1629 = vmatprep.subr.bf16.mxu0 %v472_v63  ;;  %v1398_v51 = vcombine.high %v2018_v33, %v2034_v40  ;;  %v2078_v60 = vld [vmem:[%s3252_s2 + $0x258] sm:$0xff]  ;;  %v2091_v0 = vmul.bf16 %v1968_v12, %v31_v41  ;;  %v2094_v61 = vmul.bf16 %v1968_v12, %v35_v48  ;;  %v47_v7 = vld [vmem:[%s3254_s1 + $0x100] sm:$0xff]  ;;  %v394_v26 = vld [vmem:[%s3252_s2 + $0x2c8] sm:$0xff] }
  0x24   :  { %1245 = vmatprep.subr.bf16.mxu1 %v3256_v31  ;;  %938 = vmatprep.mubr.bf16.mxu0 %v1388_v37  ;;  %v2088_v63 = vld [vmem:[%s3252_s2 + $0x358] sm:$0xff]  ;;  %v2097_v1 = vmul.bf16 %v1981_v18, %v32_v49  ;;  %v2106_v4 = vmul.bf16 %v1981_v18, %v36_v50  ;;  %v2109_v5 = vmul.bf16 %v1968_v12, %v39_v55  ;;  %v51_v8 = vld [vmem:[%s3254_s1 + $0x120] sm:$0xff]  ;;  %v56_v42 = vld [vmem:[%s3254_s1 + $0x148] sm:$0xff] }
  0x25   :  { %1051 = vmatprep.mubr.bf16.mxu1 %v1390_v45  ;;  %939 = vmatmul.mubr.bf16.vlgmr.msra.gmra.mxu0 %v1387_v38  ;;  %v2112_v6 = vmul.bf16 %v1968_v12, %v43_v56  ;;  %v462_v9 = vpack.c.bf16 %v2078_v60, %v2063_v54  ;;  %v478_v11 = vpack.c.bf16 %v2088_v63, %v2083_v62  ;;  %v2127_v14 = vld [vmem:[%s3252_s2 + $0x340] sm:$0xff]  ;;  %v60_v43 = vld [vmem:[%s3254_s1 + $0x168] sm:$0xff]  ;;  %v2225_v49 = vld [vmem:[%s3252_s2 + $0x2b0] sm:$0xff] }
  0x26   :  { %1052 = vmatmul.mubr.bf16.vlgmr.msra.gmra.mxu1 %v1389_v46  ;;  %1630 = vmatpush3.bf16.msra.mxu0 %v464_v39  ;;  %v2137_v16 = vld [vmem:[%s3252_s2 + $0x2c0] sm:$0xff]  ;;  %v2141_v19 = vpack.c.bf16 %v1931_v44, %v1931_v44  ;;  %v1395_v20 = vcombine.low %v1998_v25, %v2015_v32  ;;  %v1397_v21 = vcombine.low %v2018_v33, %v2034_v40  ;;  %v48_v44 = vld [vmem:[%s3254_s1 + $0x108] sm:$0xff]  ;;  %v2197_v39 = vld [vmem:[%s3252_s2 + $0x330] sm:$0xff] }
  0x27   :  { %946 = vmatprep.mubr.bf16.mxu0 %v1396_v47  ;;  %1059 = vmatprep.mubr.bf16.mxu1 %v1398_v51  ;;  %v2149_v23 = vmul.bf16 %v1981_v18, %v40_v2  ;;  %v2152_v24 = vmul.bf16 %v1981_v18, %v44_v3  ;;  %v52_v25 = vld [vmem:[%s3254_s1 + $0x128] sm:$0xff]  ;;  %v1404_v27 = vcombine.high %v2091_v0, %v2094_v61  ;;  %v2176_v32 = vld [vmem:[%s3252_s2 + $0x240] sm:$0xff]  ;;  %v2202_v40 = vld [vmem:[%s3252_s2 + $0x338] sm:$0xff] }
  0x28   :  { %1246 = vmatpush1.bf16.msra.mxu1 %v480_v52  ;;  %1631 = vmatprep.subr.bf16.mxu0 %v471_v53  ;;  %v1403_v28 = vcombine.low %v2091_v0, %v2094_v61  ;;  %v2168_v29 = vmul.bf16 %v1968_v12, %v47_v7  ;;  %v2171_v30 = vmul.bf16 %v1968_v12, %v51_v8  ;;  %v2181_v33 = vld [vmem:[%s3252_s2 + $0x248] sm:$0xff]  ;;  %v55_v34 = vld [vmem:[%s3254_s1 + $0x140] sm:$0xff]  ;;  %v392_v50 = vld [vmem:[%s3252_s2 + $0x2b8] sm:$0xff] }
  0x29   :  { %1247 = vmatprep.subr.bf16.mxu1 %v3256_v31  ;;  %v1406_v35 = vcombine.high %v2097_v1, %v2106_v4  ;;  %v1405_v36 = vcombine.low %v2097_v1, %v2106_v4  ;;  %v1412_v37 = vcombine.high %v2109_v5, %v2112_v6  ;;  %v1411_v38 = vcombine.low %v2109_v5, %v2112_v6  ;;  %v59_v41 = vld [vmem:[%s3254_s1 + $0x160] sm:$0xff]  ;;  %v2233_v51 = vld [vmem:[%s3252_s2 + $0x230] sm:$0xff]  ;;  %v2245_v55 = vld [vmem:[%s3252_s2 + $0x238] sm:$0xff] }
  0x2a   :  { %1632 = vmatpush3.bf16.msra.mxu0 %v463_v57  ;;  %v477_v45 = vpack.c.bf16 %v2132_v15, %v2127_v14  ;;  %v469_v46 = vpack.c.bf16 %v394_v26, %v2137_v16  ;;  %v2217_v47 = vmul.bf16 %v1981_v18, %v48_v44  ;;  %v2220_v48 = vmul.bf16 %v1981_v18, %v52_v25  ;;  %v63_v56 = vld [vmem:[%s3254_s1 + $0x180] sm:$0xff]  ;;  %v2269_v3 = vld [vmem:[%s3252_s2 + $0x328] sm:$0xff]  ;;  %v2280_v16 = vld [vmem:[%s3252_s2 + $0x310] sm:$0xff] }
  0x2b   :  { %1633 = vmatprep.subr.bf16.mxu0 %v470_v59  ;;  %v1414_v52 = vcombine.high %v2149_v23, %v2152_v24  ;;  %v1413_v53 = vcombine.low %v2149_v23, %v2152_v24  ;;  %v461_v54 = vpack.c.bf16 %v2181_v33, %v2176_v32  ;;  %v67_v57 = vld [vmem:[%s3254_s1 + $0x1a0] sm:$0xff]  ;;  %v2256_v59 = vmul.bf16 %v1968_v12, %v55_v34  ;;  %v64_v7 = vld [vmem:[%s3254_s1 + $0x188] sm:$0xff]  ;;  %v2293_v44 = vld [vmem:[%s3252_s2 + $0x318] sm:$0xff] }
  0x2c   :  { %1248 = vmatpush1.bf16.msra.mxu1 %v479_v58  ;;  %v1420_v58 = vcombine.high %v2168_v29, %v2171_v30  ;;  %v2259_v60 = vmul.bf16 %v1968_v12, %v59_v41  ;;  %v2264_v2 = vld [vmem:[%s3252_s2 + $0x320] sm:$0xff]  ;;  %v68_v8 = vld [vmem:[%s3254_s1 + $0x1a8] sm:$0xff]  ;;  %v2288_v26 = vmul.bf16 %v1981_v18, %v60_v43  ;;  %v476_v32 = vpack.c.bf16 %v2202_v40, %v2197_v39  ;;  %v41_v23 = vld [vmem:[%s3254_s1 + $0xd0] sm:$0xff] }
  0x2d   :  { %947 = vmatmul.mubr.bf16.gmra.mxu0 %v1395_v20  ;;  %1249 = vmatprep.subr.bf16.mxu1 %v3256_v31  ;;  %v2298_v25 = vld [vmem:[%s3252_s2 + $0x2a0] sm:$0xff]  ;;  %v468_v33 = vpack.c.bf16 %v392_v50, %v2225_v49  ;;  %v2334_v39 = vmul.bf16 %v1968_v12, %v63_v56  ;;  %v2337_v40 = vmul.bf16 %v1968_v12, %v67_v57  ;;  %v2342_v41 = vld [vmem:[%s3252_s2 + $0x308] sm:$0xff]  ;;  %v2369_v57 = vld [vmem:[%s3252_s2 + $0x290] sm:$0xff] }
  0x2e   :  { %1060 = vmatmul.mubr.bf16.gmra.mxu1 %v1397_v21  ;;  %954 = vmatprep.mubr.bf16.mxu0 %v1404_v27  ;;  %v2285_v21 = vmul.bf16 %v1981_v18, %v56_v42  ;;  %v2316_v34 = vld [vmem:[%s3252_s2 + $0x220] sm:$0xff]  ;;  %v2355_v50 = vmul.bf16 %v1981_v18, %v64_v7  ;;  %v76_v56 = vld [vmem:[%s3254_s1 + $0x1e8] sm:$0xff]  ;;  %v2374_v7 = vld [vmem:[%s3252_s2 + $0x298] sm:$0xff] }
  0x2f   :  { %1067 = vmatprep.mubr.bf16.mxu1 %v1406_v35  ;;  %1634 = vmatpush3.bf16.msra.mxu0 %v462_v9  ;;  %v2303_v9 = vld [vmem:[%s3252_s2 + $0x2a8] sm:$0xff]  ;;  %v2326_v62 = vld [vmem:[%s3252_s2 + $0x300] sm:$0xff]  ;;  %v2387_v20 = vld [vmem:[%s3252_s2 + $0x210] sm:$0xff] }
  0x30   :  { %1250 = vmatpush1.bf16.msra.mxu1 %v478_v11  ;;  %1635 = vmatprep.subr.bf16.mxu0 %v469_v46  ;;  %v2321_v35 = vld [vmem:[%s3252_s2 + $0x228] sm:$0xff]  ;;  %v460_v11 = vpack.c.bf16 %v2245_v55, %v2233_v51  ;;  %v71_v42 = vld [vmem:[%s3254_s1 + $0x1c0] sm:$0xff]  ;;  %v2358_v51 = vmul.bf16 %v1981_v18, %v68_v8  ;;  %v475_v46 = vpack.c.bf16 %v2269_v3, %v2264_v2  ;;  %v2397_v49 = vld [vmem:[%s3252_s2 + $0x3b0] sm:$0xff] }
  0x31   :  { %1251 = vmatprep.subr.bf16.mxu1 %v3256_v31  ;;  %v75_v43 = vld [vmem:[%s3254_s1 + $0x1e0] sm:$0xff]  ;;  %v72_v55 = vld [vmem:[%s3254_s1 + $0x1c8] sm:$0xff]  ;;  %v2402_v2 = vld [vmem:[%s3252_s2 + $0x3b8] sm:$0xff]  ;;  %v467_v3 = vpack.c.bf16 %v2303_v9, %v2298_v25  ;;  %v2410_v8 = vmul.bf16 %v1968_v12, %v71_v42  ;;  %v459_v25 = vpack.c.bf16 %v2321_v35, %v2316_v34  ;;  %v473_v9 = vpack.c.bf16 %v2342_v41, %v2326_v62 }
  0x32   :  { %v2413_v63 = vmul.bf16 %v1968_v12, %v75_v43  ;;  %v2418_v27 = vld [vmem:[%s3252_s2 + $0x3a0] sm:$0xff]  ;;  %v2423_v14 = vld [vmem:[%s3252_s2 + $0x3a8] sm:$0xff]  ;;  %v466_v43 = vpack.c.bf16 %v2374_v7, %v2369_v57  ;;  %v2493_v34 = vld [vmem:[%s3252_s2 + $0x390] sm:$0xff]  ;;  %v3265_v62 = vcombine.low %v2168_v29, %v2171_v30  ;;  %v3266_v30 = vcombine.low %v2217_v47, %v2220_v48 }
  0x33   :  { %1636 = vmatpush3.bf16.msra.mxu0 %v461_v54  ;;  %v2392_v54 = vld [vmem:[%s3252_s2 + $0x218] sm:$0xff]  ;;  %v2428_v15 = vld [vmem:[%s3252_s2 + $0x280] sm:$0xff]  ;;  %v88_v42 = vld [vmem:[%s3254_s1 + $0x248] sm:$0xff] }
  0x34   :  { %1252 = vmatpush1.bf16.msra.mxu1 %v477_v45  ;;  %1637 = vmatprep.subr.bf16.mxu0 %v468_v33  ;;  %v2443_v33 = vld [vmem:[%s3252_s2 + $0x288] sm:$0xff]  ;;  %v87_v0 = vld [vmem:[%s3254_s1 + $0x240] sm:$0xff]  ;;  %v45_v24 = vld [vmem:[%s3254_s1 + $0xf0] sm:$0xff] }
  0x35   :  { %955 = vmatmul.mubr.bf16.gmra.mxu0 %v1403_v28  ;;  %1253 = vmatprep.subr.bf16.mxu1 %v3256_v31  ;;  %v91_v61 = vld [vmem:[%s3254_s1 + $0x260] sm:$0xff]  ;;  %v92_v1 = vld [vmem:[%s3254_s1 + $0x268] sm:$0xff]  ;;  %v54_v29 = vld [vmem:[%s3254_s1 + $0x138] sm:$0xff] }
  0x36   :  { %1068 = vmatmul.mubr.bf16.gmra.mxu1 %v1405_v36  ;;  %962 = vmatprep.mubr.bf16.mxu0 %v1412_v37  ;;  %v2472_v4 = vld [vmem:[%s3252_s2 + $0x200] sm:$0xff]  ;;  %v2478_v36 = vmul.bf16 %v1981_v18, %v72_v55  ;;  %v2481_v37 = vmul.bf16 %v1981_v18, %v76_v56  ;;  %v2488_v35 = vld [vmem:[%s3252_s2 + $0x208] sm:$0xff]  ;;  %v458_v55 = vpack.c.bf16 %v2392_v54, %v2387_v20 }
  0x37   :  { %1075 = vmatprep.mubr.bf16.mxu1 %v1414_v52  ;;  %1638 = vmatpush3.bf16.msra.mxu0 %v460_v11  ;;  %v2498_v52 = vld [vmem:[%s3252_s2 + $0x398] sm:$0xff]  ;;  %v484_v56 = vpack.c.bf16 %v2402_v2, %v2397_v49  ;;  %v2509_v57 = vld [vmem:[%s3252_s2 + $0x380] sm:$0xff]  ;;  %v2514_v7 = vld [vmem:[%s3252_s2 + $0x388] sm:$0xff]  ;;  %v465_v20 = vpack.c.bf16 %v2443_v33, %v2428_v15  ;;  %v2522_v54 = vmul.bf16 %v1968_v12, %v87_v0 }
  0x38   :  { %1254 = vmatpush1.bf16.msra.mxu1 %v476_v32  ;;  %1639 = vmatprep.subr.bf16.mxu0 %v467_v3  ;;  %v2525_v3 = vmul.bf16 %v1968_v12, %v91_v61  ;;  %v2528_v11 = vmul.bf16 %v1981_v18, %v88_v42  ;;  %v2531_v28 = vmul.bf16 %v1981_v18, %v92_v1  ;;  %v17_v15 = vld [vmem:[%s3254_s1 + $0x10] sm:$0xff]  ;;  %v66_v49 = vld [vmem:[%s3254_s1 + $0x198] sm:$0xff] }
  0x39   :  { %1255 = vmatprep.subr.bf16.mxu1 %v3256_v31  ;;  %v457_v45 = vpack.c.bf16 %v2488_v35, %v2472_v4  ;;  %v21_v33 = vld [vmem:[%s3254_s1 + $0x30] sm:$0xff]  ;;  %v2551_v42 = vcombine.low %v1966_v10, %v1993_v22  ;;  %v144_v10 = vpack.c.bf16 %v1979_v17, %v1979_v17  ;;  %v78_v32 = vld [vmem:[%s3254_s1 + $0x1f8] sm:$0xff] }
  0x3a   :  { %v25_v1 = vld [vmem:[%s3254_s1 + $0x50] sm:$0xff] }
  0x3b   :  { %1640 = vmatpush3.bf16.msra.mxu0 %v459_v25  ;;  %v29_v25 = vld [vmem:[%s3254_s1 + $0x70] sm:$0xff]  ;;  %v2570_v22 = vmul.bf16 %v2551_v42, %v17_v15  ;;  %v195_v17 = vpack.i.b16 %v144_v10, %v144_v10  ;;  %v2587_v5 = vmul.bf16 %v2551_v42, %v25_v1  ;;  %v18_v10 = vld [vmem:[%s3254_s1 + $0x18] sm:$0xff] }
  0x3c   :  { %1256 = vmatpush1.bf16.msra.mxu1 %v475_v46  ;;  %1641 = vmatprep.subr.bf16.mxu0 %v466_v43  ;;  %v2573_v46 = vmul.bf16 %v2551_v42, %v21_v33  ;;  %v188_v43 = vpack.i.b16 %v2141_v19, %v2141_v19  ;;  %v33_v61 = vld [vmem:[%s3254_s1 + $0x90] sm:$0xff]  ;;  %v2590_v6 = vmul.bf16 %v2551_v42, %v29_v25 }
  0x3d   :  { %963 = vmatmul.mubr.bf16.gmra.mxu0 %v1411_v38  ;;  %1257 = vmatprep.subr.bf16.mxu1 %v3256_v31  ;;  %v37_v19 = vld [vmem:[%s3254_s1 + $0xb0] sm:$0xff]  ;;  %v3263_v38 = vcombine.high %v2217_v47, %v2220_v48  ;;  %v3264_v25 = vpack.c.bf16 %v2293_v44, %v2280_v16  ;;  %v22_v16 = vld [vmem:[%s3254_s1 + $0x38] sm:$0xff]  ;;  %v3268_v48 = vcombine.high %v2285_v21, %v2288_v26 }
  0x3e   :  { %1076 = vmatmul.mubr.bf16.gmra.mxu1 %v1413_v53  ;;  %970 = vmatprep.mubr.bf16.mxu0 %v1420_v58  ;;  %v193_v15 = vrot.slane %v188_v43, %v1889_v13  ;;  %v49_v33 = vld [vmem:[%s3254_s1 + $0x110] sm:$0xff]  ;;  %v200_v43 = vrot.slane %v195_v17, %v1889_v13  ;;  %v26_v44 = vld [vmem:[%s3254_s1 + $0x58] sm:$0xff]  ;;  %v2643_v17 = vmul.bf16 %v2551_v42, %v37_v19 }
  0x3f   :  { %1083 = vmatprep.mubr.bf16.mxu1 %v3263_v38  ;;  %1642 = vmatpush3.bf16.msra.mxu0 %v458_v55  ;;  %v53_v1 = vld [vmem:[%s3254_s1 + $0x130] sm:$0xff]  ;;  %v30_v13 = vld [vmem:[%s3254_s1 + $0x78] sm:$0xff]  ;;  %v2649_v53 = vmul.bf16 %v2551_v42, %v45_v24 }
  0x40   :  { %v57_v55 = vld [vmem:[%s3254_s1 + $0x150] sm:$0xff]  ;;  %1258 = vmatpush1.bf16.msra.mxu1 %v3264_v25  ;;  %1643 = vmatprep.subr.bf16.mxu0 %v465_v20  ;;  %v2640_v20 = vmul.bf16 %v2551_v42, %v33_v61  ;;  %v2646_v25 = vmul.bf16 %v2551_v42, %v41_v23  ;;  %v2651_v38 = vcombine.low %v193_v15, %v200_v43  ;;  %v34_v58 = vld [vmem:[%s3254_s1 + $0x98] sm:$0xff] }
  0x41   :  { %1259 = vmatprep.subr.bf16.mxu1 %v3256_v31  ;;  %v38_v61 = vld [vmem:[%s3254_s1 + $0xb8] sm:$0xff]  ;;  %v2663_v23 = vmul.bf16 %v2551_v42, %v49_v33  ;;  %v2666_v24 = vmul.bf16 %v2551_v42, %v53_v1  ;;  %v2669_v15 = vmul.bf16 %v2551_v42, %v57_v55 }
  0x42   :  { %v42_v19 = vld [vmem:[%s3254_s1 + $0xd8] sm:$0xff]  ;;  %v2683_v1 = vmul.bf16 %v2651_v38, %v18_v10  ;;  %v2689_v55 = vmul.bf16 %v2651_v38, %v26_v44  ;;  %v2692_v4 = vmul.bf16 %v2651_v38, %v30_v13  ;;  %v2702_v41 = vmul.bf16 %v2651_v38, %v34_v58  ;;  %v77_v44 = vld [vmem:[%s3254_s1 + $0x1f0] sm:$0xff] }
  0x43   :  { %1644 = vmatpush3.bf16.msra.mxu0 %v457_v45  ;;  %v2686_v45 = vmul.bf16 %v2651_v38, %v22_v16  ;;  %v46_v33 = vld [vmem:[%s3254_s1 + $0xf8] sm:$0xff]  ;;  %v2708_v10 = vmul.bf16 %v2651_v38, %v42_v19  ;;  %v3267_v58 = vcombine.high %v2256_v59, %v2259_v60  ;;  %v61_v19 = vld [vmem:[%s3254_s1 + $0x170] sm:$0xff]  ;;  %v2845_v35 = vmul.bf16 %v2551_v42, %v77_v44 }
  0x44   :  { %1260 = vmatpush1.bf16.msra.mxu1 %v473_v9  ;;  %v2705_v9 = vmul.bf16 %v2651_v38, %v38_v61  ;;  %v50_v16 = vld [vmem:[%s3254_s1 + $0x118] sm:$0xff]  ;;  %v2744_v0 = vmul.bf16 %v2651_v38, %v46_v33  ;;  %v69_v61 = vld [vmem:[%s3254_s1 + $0x1b0] sm:$0xff]  ;;  %v3274_v44 = vcombine.high %v2334_v39, %v2337_v40 }
  0x45   :  { %971 = vmatmul.mubr.bf16.gmra.mxu0 %v3265_v62  ;;  %1269 = vmatprep.subr.bf16.mxu1 %v3256_v31  ;;  %v58_v47 = vld [vmem:[%s3254_s1 + $0x158] sm:$0xff]  ;;  %v2760_v33 = vmul.bf16 %v2651_v38, %v50_v16  ;;  %v2763_v62 = vmul.bf16 %v2651_v38, %v54_v29  ;;  %v2777_v16 = vmul.bf16 %v2551_v42, %v61_v19 }
  0x46   :  { %1084 = vmatmul.mubr.bf16.gmra.mxu1 %v3266_v30  ;;  %978 = vmatprep.mubr.bf16.mxu0 %v3267_v58  ;;  %v62_v43 = vld [vmem:[%s3254_s1 + $0x178] sm:$0xff]  ;;  %v2780_v29 = vmul.bf16 %v2651_v38, %v58_v47  ;;  %v73_v30 = vld [vmem:[%s3254_s1 + $0x1d0] sm:$0xff]  ;;  %v2806_v2 = vmul.bf16 %v2551_v42, %v69_v61 }
  0x47   :  { %1091 = vmatprep.mubr.bf16.mxu1 %v3268_v48  ;;  %v65_v48 = vld [vmem:[%s3254_s1 + $0x190] sm:$0xff]  ;;  %v70_v58 = vld [vmem:[%s3254_s1 + $0x1b8] sm:$0xff]  ;;  %v2793_v19 = vmul.bf16 %v2651_v38, %v62_v43 }
  0x48   :  { %1270 = vmatpush2.bf16.msra.mxu1 %v484_v56  ;;  %v2796_v47 = vmul.bf16 %v2551_v42, %v65_v48  ;;  %3269 = vst [vmem:[#allocation2_spill] sm:$0xff] %v2806_v2  ;;  %v2809_v56 = vmul.bf16 %v2651_v38, %v66_v49  ;;  %v74_v43 = vld [vmem:[%s3254_s1 + $0x1d8] sm:$0xff]  ;;  %v3270_v48 = vpack.c.bf16 %v2423_v14, %v2418_v27  ;;  %v81_v27 = vld [vmem:[%s3254_s1 + $0x210] sm:$0xff] }
  0x49   :  { %1271 = vmatprep.subr.bf16.mxu1 %v3256_v31  ;;  %v2822_v61 = vmul.bf16 %v2651_v38, %v70_v58  ;;  %v2825_v49 = vmul.bf16 %v2551_v42, %v73_v30  ;;  %v85_v14 = vld [vmem:[%s3254_s1 + $0x230] sm:$0xff]  ;;  %v82_v13 = vld [vmem:[%s3254_s1 + $0x218] sm:$0xff]  ;;  %v2886_v30 = vmul.bf16 %v2551_v42, %v81_v27  ;;  %v3276_v58 = vpack.c.bf16 %v2498_v52, %v2493_v34 }
  0x4a   :  { %v93_v2 = vld [vmem:[%s3254_s1 + $0x270] sm:$0xff]  ;;  %v3277_v27 = vmov 0   ;;  %v1446_v52 = vcombine.high %v2478_v36, %v2481_v37  ;;  %v3279_v34 = vpack.c.bf16 %v2514_v7, %v2509_v57 }
  0x4b   :  { %3271 = vst [vmem:[#allocation3_spill] sm:$0xff] %v2822_v61  ;;  %v2892_v61 = vmul.bf16 %v2551_v42, %v85_v14 }
  0x4c   :  { %1272 = vmatpush2.bf16.msra.mxu1 %v3270_v48  ;;  %v3272_v48 = vcombine.low %v2256_v59, %v2259_v60  ;;  %v86_v59 = vld [vmem:[%s3254_s1 + $0x238] sm:$0xff]  ;;  %v89_v60 = vld [vmem:[%s3254_s1 + $0x250] sm:$0xff] }
  0x4d   :  { %1273 = vmatprep.subr.bf16.mxu1 %v3256_v31  ;;  %v2867_v31 = vmul.bf16 %v2651_v38, %v74_v43  ;;  %v2883_v43 = vmul.bf16 %v2651_v38, %v78_v32  ;;  %v94_v32 = vld [vmem:[%s3254_s1 + $0x278] sm:$0xff] }
  0x4e   :  { %979 = vmatmul.mubr.bf16.gmra.mxu0 %v3272_v48  ;;  %v3273_v48 = vcombine.low %v2285_v21, %v2288_v26  ;;  %v90_v21 = vld [vmem:[%s3254_s1 + $0x258] sm:$0xff]  ;;  %v3275_v26 = vcombine.high %v2355_v50, %v2358_v51 }
  0x4f   :  { %986 = vmatprep.mubr.bf16.mxu0 %v3274_v44  ;;  %v2901_v44 = vmul.bf16 %v2551_v42, %v89_v60  ;;  %v2915_v14 = vmul.bf16 %v2651_v38, %v90_v21  ;;  %v2938_v60 = vmul.bf16 %v2651_v38, %v94_v32  ;;  %v3280_v21 = vcombine.low %v2334_v39, %v2337_v40 }
  0x50   :  { %1092 = vmatmul.mubr.bf16.gmra.mxu1 %v3273_v48  ;;  %v2898_v48 = vmul.bf16 %v2651_v38, %v86_v59  ;;  %v3281_v59 = vcombine.low %v2355_v50, %v2358_v51  ;;  %v1445_v50 = vcombine.low %v2478_v36, %v2481_v37  ;;  %v3287_v36 = vcombine.high %v2570_v22, %v2573_v46 }
  0x51   :  { %1099 = vmatprep.mubr.bf16.mxu1 %v3275_v26  ;;  %1274 = vmatpush2.bf16.msra.mxu1 %v3276_v58  ;;  %v2895_v26 = vmul.bf16 %v2651_v38, %v82_v13  ;;  %v2912_v13 = vmul.bf16 %v2551_v42, %v93_v2  ;;  %v79_v42 = vld [vmem:[%s3254_s1 + $0x200] sm:$0xff]  ;;  %v84_v58 = vld [vmem:[%s3254_s1 + $0x228] sm:$0xff]  ;;  %v1466_v38 = vcombine.high %v2915_v14, %v2938_v60 }
  0x52   :  { %1275 = vmatprep.subr.bf16.mxu1 %v3277_v27  ;;  %v83_v2 = vld [vmem:[%s3254_s1 + $0x220] sm:$0xff]  ;;  %v80_v27 = vld [vmem:[%s3254_s1 + $0x208] sm:$0xff]  ;;  %v1465_v32 = vcombine.low %v2915_v14, %v2938_v60  ;;  %v289_v57 = vmul.bf16 %v1968_v12, %v79_v42  ;;  %v294_v40 = vmul.bf16 %v1981_v18, %v84_v58  ;;  %v3288_v37 = vcombine.high %v2683_v1, %v2686_v45 }
  0x53   :  { %3278 = vst [vmem:[#allocation4_spill] sm:$0xff] %v2912_v13  ;;  %v3282_v13 = vcombine.high %v2410_v8, %v2413_v63  ;;  %v293_v7 = vmul.bf16 %v1968_v12, %v83_v2  ;;  %v290_v39 = vmul.bf16 %v1981_v18, %v80_v27  ;;  %v3283_v12 = vcombine.high %v2522_v54, %v2525_v3 }
  0x54   :  { %v3284_v18 = vcombine.high %v2528_v11, %v2531_v28  ;;  %v3322_v2 = vcombine.high %v2895_v26, %v2898_v48 }
  0x55   :  { %1276 = vmatpush2.bf16.msra.mxu1 %v3279_v34  ;;  %v1443_v34 = vcombine.low %v2410_v8, %v2413_v63  ;;  %v1452_v51 = vcombine.high %v289_v57, %v293_v7  ;;  %v1453_v42 = vcombine.low %v290_v39, %v294_v40  ;;  %v3285_v63 = vcombine.low %v2522_v54, %v2525_v3 }
  0x56   :  { %987 = vmatmul.mubr.bf16.gmra.mxu0 %v3280_v21  ;;  %v3286_v8 = vcombine.low %v2528_v11, %v2531_v28  ;;  %v3290_v54 = vcombine.low %v2683_v1, %v2686_v45  ;;  %v3291_v28 = vcombine.high %v2587_v5, %v2590_v6  ;;  %v3292_v11 = vcombine.high %v2689_v55, %v2692_v4 }
  0x57   :  { %994 = vmatprep.mubr.bf16.mxu0 %v3282_v13  ;;  %v1451_v13 = vcombine.low %v289_v57, %v293_v7  ;;  %v3293_v3 = vcombine.low %v2587_v5, %v2590_v6  ;;  %v3296_v1 = vcombine.high %v2702_v41, %v2705_v9  ;;  %v3297_v45 = vcombine.low %v2640_v20, %v2643_v17 }
  0x58   :  { %1100 = vmatmul.mubr.bf16.gmra.mxu1 %v3281_v59  ;;  %v1454_v59 = vcombine.high %v290_v39, %v294_v40  ;;  %v3298_v5 = vcombine.low %v2702_v41, %v2705_v9  ;;  %v3300_v6 = vcombine.high %v2708_v10, %v2744_v0  ;;  %v3304_v41 = vcombine.high %v2760_v33, %v2763_v62 }
  0x59   :  { %1107 = vmatprep.mubr.bf16.mxu1 %v1446_v52  ;;  %v3289_v52 = vcombine.low %v2570_v22, %v2573_v46  ;;  %v3294_v22 = vcombine.low %v2689_v55, %v2692_v4  ;;  %v3295_v46 = vcombine.high %v2640_v20, %v2643_v17  ;;  %v3299_v4 = vcombine.high %v2646_v25, %v2649_v53 }
  0x5a   :  { %v3301_v55 = vcombine.low %v2646_v25, %v2649_v53  ;;  %v3302_v20 = vcombine.low %v2708_v10, %v2744_v0  ;;  %v3303_v17 = vcombine.high %v2663_v23, %v2666_v24  ;;  %v3305_v9 = vcombine.low %v2663_v23, %v2666_v24  ;;  %v3311_v24 = vld [vmem:[#allocation2_spill] sm:$0xff] }
  0x5b   :  { %v3306_v53 = vcombine.low %v2760_v33, %v2763_v62  ;;  %v3307_v0 = vcombine.high %v2669_v15, %v2777_v16  ;;  %v3308_v25 = vcombine.high %v2780_v29, %v2793_v19  ;;  %v3309_v10 = vcombine.low %v2669_v15, %v2777_v16  ;;  %v3313_v33 = vld [vmem:[#allocation3_spill] sm:$0xff] }
  0x5c   :  { %v3310_v23 = vcombine.low %v2780_v29, %v2793_v19  ;;  %v3312_v62 = vcombine.high %v2796_v47, %v3311_v24  ;;  %v3314_v58 = vcombine.high %v2809_v56, %v3313_v33  ;;  %v3315_v27 = vcombine.low %v2796_v47, %v3311_v24 }
  0x5d   :  { %v3316_v15 = vcombine.low %v2809_v56, %v3313_v33  ;;  %v3317_v16 = vcombine.high %v2825_v49, %v2845_v35  ;;  %v3318_v29 = vcombine.high %v2867_v31, %v2883_v43  ;;  %v3319_v19 = vcombine.low %v2825_v49, %v2845_v35 }
  0x5e   :  { %995 = vmatmul.mubr.bf16.gmra.mxu0 %v1443_v34  ;;  %v3320_v47 = vcombine.low %v2867_v31, %v2883_v43  ;;  %v3321_v56 = vcombine.high %v2886_v30, %v2892_v61  ;;  %v3323_v21 = vcombine.low %v2886_v30, %v2892_v61  ;;  %v3324_v35 = vcombine.low %v2895_v26, %v2898_v48  ;;  %v3325_v31 = vld [vmem:[#allocation4_spill] sm:$0xff] }
  0x5f   :  { %1002 = vmatprep.mubr.bf16.mxu0 %v1452_v51  ;;  %v3326_v49 = vcombine.high %v2901_v44, %v3325_v31  ;;  %v3327_v43 = vcombine.low %v2901_v44, %v3325_v31 }
  0x60   :  { %1108 = vmatmul.mubr.bf16.gmra.mxu1 %v1445_v50 }
  0x61   :  { %1115 = vmatprep.mubr.bf16.mxu1 %v1454_v59 }
  0x66   :  { %1003 = vmatmul.mubr.bf16.gmra.mxu0 %v1451_v13 }
  0x67   :  { %1010 = vmatprep.mubr.bf16.mxu0 %v3283_v12 }
  0x68   :  { %1116 = vmatmul.mubr.bf16.gmra.mxu1 %v1453_v42 }
  0x69   :  { %1123 = vmatprep.mubr.bf16.mxu1 %v3284_v18 }
  0x6e   :  { %1011 = vmatmul.mubr.bf16.gmra.mxu0 %v3285_v63 }
  0x6f   :  { %1164 = vmatprep.mubr.bf16.mxu0 %v3287_v36 }
  0x70   :  { %1124 = vmatmul.mubr.bf16.gmra.mxu1 %v3286_v8 }
  0x71   :  { %1467 = vmatprep.mubr.msk.bf16.mxu1 %vm875_vm0, %v3288_v37 }
  0x76   :  { %1165 = vmatmul.mubr.bf16.vlgmr.msra.gmra.mxu0 %v3289_v52 }
  0x77   :  { %1172 = vmatprep.mubr.bf16.mxu0 %v3291_v28 }
  0x78   :  { %1278 = vmatmul.mubr.bf16.vlgmr.msra.gmra.mxu1 %v3290_v54 }
  0x79   :  { %1468 = vmatprep.mubr.msk.bf16.mxu1 %vm875_vm0, %v3292_v11 }
  0x7e   :  { %1173 = vmatmul.mubr.bf16.gmra.mxu0 %v3293_v3 }
  0x7f   :  { %1180 = vmatprep.mubr.bf16.mxu0 %v3295_v46 }
  0x80   :  { %1286 = vmatmul.mubr.bf16.gmra.mxu1 %v3294_v22 }
  0x81   :  { %1469 = vmatprep.mubr.msk.bf16.mxu1 %vm875_vm0, %v3296_v1 }
  0x86   :  { %1181 = vmatmul.mubr.bf16.gmra.mxu0 %v3297_v45 }
  0x87   :  { %1188 = vmatprep.mubr.bf16.mxu0 %v3299_v4 }
  0x88   :  { %1294 = vmatmul.mubr.bf16.gmra.mxu1 %v3298_v5 }
  0x89   :  { %1470 = vmatprep.mubr.msk.bf16.mxu1 %vm875_vm0, %v3300_v6 }
  0x8e   :  { %1189 = vmatmul.mubr.bf16.gmra.mxu0 %v3301_v55 }
  0x8f   :  { %1196 = vmatprep.mubr.bf16.mxu0 %v3303_v17 }
  0x90   :  { %1302 = vmatmul.mubr.bf16.gmra.mxu1 %v3302_v20 }
  0x91   :  { %1471 = vmatprep.mubr.msk.bf16.mxu1 %vm875_vm0, %v3304_v41 }
  0x96   :  { %1197 = vmatmul.mubr.bf16.gmra.mxu0 %v3305_v9 }
  0x97   :  { %1204 = vmatprep.mubr.bf16.mxu0 %v3307_v0 }
  0x98   :  { %1310 = vmatmul.mubr.bf16.gmra.mxu1 %v3306_v53 }
  0x99   :  { %1472 = vmatprep.mubr.msk.bf16.mxu1 %vm875_vm0, %v3308_v25 }
  0x9e   :  { %1205 = vmatmul.mubr.bf16.gmra.mxu0 %v3309_v10 }
  0x9f   :  { %1212 = vmatprep.mubr.bf16.mxu0 %v3312_v62 }
  0xa0   :  { %1318 = vmatmul.mubr.bf16.gmra.mxu1 %v3310_v23 }
  0xa1   :  { %1473 = vmatprep.mubr.msk.bf16.mxu1 %vm875_vm0, %v3314_v58 }
  0xa6   :  { %1213 = vmatmul.mubr.bf16.gmra.mxu0 %v3315_v27 }
  0xa7   :  { %1220 = vmatprep.mubr.bf16.mxu0 %v3317_v16 }
  0xa8   :  { %1326 = vmatmul.mubr.bf16.gmra.mxu1 %v3316_v15 }
  0xa9   :  { %1474 = vmatprep.mubr.msk.bf16.mxu1 %vm875_vm0, %v3318_v29 }
  0xae   :  { %1221 = vmatmul.mubr.bf16.gmra.mxu0 %v3319_v19 }
  0xaf   :  { %1228 = vmatprep.mubr.bf16.mxu0 %v3321_v56 }
  0xb0   :  { %1334 = vmatmul.mubr.bf16.gmra.mxu1 %v3320_v47 }
  0xb1   :  { %1475 = vmatprep.mubr.msk.bf16.mxu1 %vm875_vm0, %v3322_v2 }
  0xb6   :  { %1229 = vmatmul.mubr.bf16.gmra.mxu0 %v3323_v21 }
  0xb7   :  { %1236 = vmatprep.mubr.bf16.mxu0 %v3326_v49 }
  0xb8   :  { %1342 = vmatmul.mubr.bf16.gmra.mxu1 %v3324_v35 }
  0xb9   :  { %1476 = vmatprep.mubr.msk.bf16.mxu1 %vm875_vm0, %v1466_v38 }
  0xbe   :  { %1237 = vmatmul.mubr.bf16.gmra.mxu0 %v3327_v43 }
  0xc0   :  { %1350 = vmatmul.mubr.bf16.gmra.mxu1 %v1465_v32 }
  0xe5   :  { %v1493_v61 = vpop.f32.mrf.mxu0 }
  0xe6   :  { %v1569_v30 = vpop.f32.mrf.mxu1 }
  0xe7   :  { %v1494_v48 = vpop.f32.mrf.mxu0 }
  0xe8   :  { %v1495_v26 = vadd.f32 %v1494_v48, %v1493_v61  ;;  %v1570_v57 = vpop.f32.mrf.mxu1 }
  0xe9   :  { %v1571_v7 = vadd.f32 %v1570_v57, %v1569_v30  ;;  %v1496_v39 = vpop.f32.mrf.mxu0 }
  0xea   :  { %v1572_v40 = vpop.f32.mrf.mxu1 }
  0xeb   :  { %v3112_v34 = vadd.f32 %v1571_v7, %v1495_v26  ;;  %v1497_v50 = vpop.f32.mrf.mxu0 }
  0xec   :  { %v1498_v38 = vadd.f32 %v1497_v50, %v1496_v39  ;;  %v1573_v51 = vpop.f32.mrf.mxu1 }
  0xed   :  { %v1574_v59 = vadd.f32 %v1573_v51, %v1572_v40  ;;  %v1499_v44 = vpop.f32.mrf.mxu0 }
  0xee   :  { %v1575_v13 = vpop.f32.mrf.mxu1 }
  0xef   :  { %v3114_v42 = vadd.f32 %v1574_v59, %v1498_v38  ;;  %v1500_v14 = vpop.f32.mrf.mxu0 }
  0xf0   :  { %v1501_v60 = vadd.f32 %v1500_v14, %v1499_v44  ;;  %v1576_v32 = vpop.f32.mrf.mxu1 }
  0xf1   :  { %v1577_v12 = vadd.f32 %v1576_v32, %v1575_v13  ;;  %v1502_v18 = vpop.f32.mrf.mxu0 }
  0xf2   :  { %v1578_v63 = vpop.f32.mrf.mxu1 }
  0xf3   :  { %v3116_v8 = vadd.f32 %v1577_v12, %v1501_v60  ;;  %v1503_v36 = vpop.f32.mrf.mxu0 }
  0xf4   :  { %v1504_v37 = vadd.f32 %v1503_v36, %v1502_v18  ;;  %v1579_v52 = vpop.f32.mrf.mxu1 }
  0xf5   :  { %v1580_v54 = vadd.f32 %v1579_v52, %v1578_v63  ;;  %v1505_v28 = vpop.f32.mrf.mxu0 }
  0xf6   :  { %v1581_v11 = vpop.f32.mrf.mxu1 }
  0xf7   :  { %v3118_v3 = vadd.f32 %v1580_v54, %v1504_v37  ;;  %v1506_v22 = vpop.f32.mrf.mxu0 }
  0xf8   :  { %v1507_v46 = vadd.f32 %v1506_v22, %v1505_v28  ;;  %v1582_v1 = vpop.f32.mrf.mxu1 }
  0xf9   :  { %v1583_v45 = vadd.f32 %v1582_v1, %v1581_v11  ;;  %v1508_v5 = vpop.f32.mrf.mxu0 }
  0xfa   :  { %v1584_v4 = vpop.f32.mrf.mxu1 }
  0xfb   :  { %v3120_v6 = vadd.f32 %v1583_v45, %v1507_v46  ;;  %v1509_v55 = vpop.f32.mrf.mxu0 }
  0xfc   :  { %v1510_v20 = vadd.f32 %v1509_v55, %v1508_v5  ;;  %v1585_v17 = vpop.f32.mrf.mxu1 }
  0xfd   :  { %v1586_v41 = vadd.f32 %v1585_v17, %v1584_v4  ;;  %v1511_v9 = vpop.f32.mrf.mxu0 }
  0xfe   :  { %v1587_v53 = vpop.f32.mrf.mxu1 }
  0xff   :  { %v3122_v0 = vadd.f32 %v1586_v41, %v1510_v20  ;;  %v1512_v25 = vpop.f32.mrf.mxu0 }
 0x100   :  { %v1513_v10 = vadd.f32 %v1512_v25, %v1511_v9  ;;  %v1588_v23 = vpop.f32.mrf.mxu1 }
 0x101   :  { %v1589_v24 = vadd.f32 %v1588_v23, %v1587_v53  ;;  %v1514_v62 = vpop.f32.mrf.mxu0 }
 0x102   :  { %v1590_v33 = vpop.f32.mrf.mxu1 }
 0x103   :  { %v3124_v58 = vadd.f32 %v1589_v24, %v1513_v10  ;;  %v1515_v27 = vpop.f32.mrf.mxu0 }
 0x104   :  { %v1516_v15 = vadd.f32 %v1515_v27, %v1514_v62  ;;  %v1591_v16 = vpop.f32.mrf.mxu1 }
 0x105   :  { %v1592_v29 = vadd.f32 %v1591_v16, %v1590_v33  ;;  %v1517_v19 = vpop.f32.mrf.mxu0 }
 0x106   :  { %v1593_v47 = vpop.f32.mrf.mxu1 }
 0x107   :  { %v3126_v56 = vadd.f32 %v1592_v29, %v1516_v15  ;;  %v1518_v2 = vpop.f32.mrf.mxu0 }
 0x108   :  { %v1519_v21 = vadd.f32 %v1518_v2, %v1517_v19  ;;  %v1594_v35 = vpop.f32.mrf.mxu1 }
 0x109   :  { %v1595_v31 = vadd.f32 %v1594_v35, %v1593_v47  ;;  %v1520_v49 = vpop.f32.mrf.mxu0 }
 0x10a   :  { %v1596_v43 = vpop.f32.mrf.mxu1 }
 0x10b   :  { %v3128_v61 = vadd.f32 %v1595_v31, %v1519_v21  ;;  %v1521_v30 = vpop.f32.mrf.mxu0 }
 0x10c   :  { %v1522_v48 = vadd.f32 %v1521_v30, %v1520_v49  ;;  %v1597_v26 = vpop.f32.mrf.mxu1 }
 0x10d   :  { %v1598_v57 = vadd.f32 %v1597_v26, %v1596_v43 }
 0x10e   :  { %v1523_v7 = vpop.f32.mrf.mxu0 }
 0x10f   :  { %v3130_v40 = vadd.f32 %v1598_v57, %v1522_v48 }
 0x110   :  { %v1599_v39 = vpop.f32.mrf.mxu1  ;;  %v1524_v50 = vpop.f32.mrf.mxu0 }
 0x111   :  { %v1525_v38 = vadd.f32 %v1524_v50, %v1523_v7 }
 0x112   :  { %v1600_v51 = vpop.f32.mrf.mxu1  ;;  %v1526_v44 = vpop.f32.mrf.mxu0 }
 0x113   :  { %v1601_v59 = vadd.f32 %v1600_v51, %v1599_v39 }
 0x114   :  { %v1602_v13 = vpop.f32.mrf.mxu1  ;;  %v1527_v60 = vpop.f32.mrf.mxu0 }
 0x115   :  { %v3132_v14 = vadd.f32 %v1601_v59, %v1525_v38  ;;  %v1528_v32 = vadd.f32 %v1527_v60, %v1526_v44 }
 0x116   :  { %v1603_v12 = vpop.f32.mrf.mxu1  ;;  %v1529_v63 = vpop.f32.mrf.mxu0 }
 0x117   :  { %v1604_v18 = vadd.f32 %v1603_v12, %v1602_v13 }
 0x118   :  { %v1605_v36 = vpop.f32.mrf.mxu1  ;;  %v1530_v52 = vpop.f32.mrf.mxu0 }
 0x119   :  { %v3134_v37 = vadd.f32 %v1604_v18, %v1528_v32  ;;  %v1531_v54 = vadd.f32 %v1530_v52, %v1529_v63 }
 0x11a   :  { %v1606_v28 = vpop.f32.mrf.mxu1  ;;  %v1532_v22 = vpop.f32.mrf.mxu0 }
 0x11b   :  { %v1607_v11 = vadd.f32 %v1606_v28, %v1605_v36 }
 0x11c   :  { %v1608_v46 = vpop.f32.mrf.mxu1  ;;  %v1533_v45 = vpop.f32.mrf.mxu0 }
 0x11d   :  { %v3136_v1 = vadd.f32 %v1607_v11, %v1531_v54  ;;  %v1534_v5 = vadd.f32 %v1533_v45, %v1532_v22 }
 0x11e   :  { %v1609_v4 = vpop.f32.mrf.mxu1  ;;  %v1535_v20 = vpop.f32.mrf.mxu0 }
 0x11f   :  { %v1610_v55 = vadd.f32 %v1609_v4, %v1608_v46 }
 0x120   :  { %v1611_v17 = vpop.f32.mrf.mxu1  ;;  %v1536_v9 = vpop.f32.mrf.mxu0 }
 0x121   :  { %v3138_v41 = vadd.f32 %v1610_v55, %v1534_v5  ;;  %v1537_v53 = vadd.f32 %v1536_v9, %v1535_v20 }
 0x122   :  { %v1612_v25 = vpop.f32.mrf.mxu1  ;;  %v1538_v23 = vpop.f32.mrf.mxu0 }
 0x123   :  { %v1613_v10 = vadd.f32 %v1612_v25, %v1611_v17 }
 0x124   :  { %v1614_v24 = vpop.f32.mrf.mxu1  ;;  %v1539_v33 = vpop.f32.mrf.mxu0 }
 0x125   :  { %v3140_v62 = vadd.f32 %v1613_v10, %v1537_v53  ;;  %v1540_v27 = vadd.f32 %v1539_v33, %v1538_v23 }
 0x126   :  { %v1615_v15 = vpop.f32.mrf.mxu1  ;;  %v1541_v29 = vpop.f32.mrf.mxu0 }
 0x127   :  { %v1616_v16 = vadd.f32 %v1615_v15, %v1614_v24 }
 0x128   :  { %v1617_v19 = vpop.f32.mrf.mxu1  ;;  %v1542_v2 = vpop.f32.mrf.mxu0 }
 0x129   :  { %v3142_v47 = vadd.f32 %v1616_v16, %v1540_v27  ;;  %v1543_v21 = vadd.f32 %v1542_v2, %v1541_v29 }
 0x12a   :  { %v1618_v35 = vpop.f32.mrf.mxu1  ;;  %v1544_v49 = vpop.f32.mrf.mxu0 }
 0x12b   :  { %v1619_v31 = vadd.f32 %v1618_v35, %v1617_v19 }
 0x12c   :  { %v1620_v43 = vpop.f32.mrf.mxu1  ;;  %v1545_v48 = vpop.f32.mrf.mxu0 }
 0x12d   :  { %v3144_v30 = vadd.f32 %v1619_v31, %v1543_v21  ;;  %v1546_v26 = vadd.f32 %v1545_v48, %v1544_v49 }
 0x12e   :  { %v1621_v57 = vpop.f32.mrf.mxu1  ;;  %v1547_v39 = vpop.f32.mrf.mxu0 }
 0x12f   :  { %v1622_v7 = vadd.f32 %v1621_v57, %v1620_v43 }
 0x130   :  { %v1623_v50 = vpop.f32.mrf.mxu1  ;;  %v1548_v51 = vpop.f32.mrf.mxu0 }
 0x131   :  { %v3146_v38 = vadd.f32 %v1622_v7, %v1546_v26  ;;  %v1549_v59 = vadd.f32 %v1548_v51, %v1547_v39 }
 0x132   :  { %v1624_v44 = vpop.f32.mrf.mxu1  ;;  %v1550_v60 = vpop.f32.mrf.mxu0 }
 0x133   :  { %v1625_v13 = vadd.f32 %v1624_v44, %v1623_v50 }
 0x134   :  { %v1626_v32 = vpop.f32.mrf.mxu1  ;;  %v1551_v18 = vpop.f32.mrf.mxu0 }
 0x135   :  { %v3148_v12 = vadd.f32 %v1625_v13, %v1549_v59  ;;  %v1552_v63 = vadd.f32 %v1551_v18, %v1550_v60 }
 0x136   :  { %v1627_v36 = vpop.f32.mrf.mxu1  ;;  %v1645_v54 = vpop.f32.mrf.mxu0 }
 0x137   :  { %v1628_v52 = vadd.f32 %v1627_v36, %v1626_v32 }
 0x138   :  { %v1279_v28 = vpop.f32.mrf.mxu1  ;;  %v1646_v22 = vpop.f32.mrf.mxu0 }
 0x139   :  { %v3150_v11 = vadd.f32 %v1628_v52, %v1552_v63  ;;  %v1647_v46 = vadd.f32 %v1646_v22, %v1645_v54 }
 0x13a   :  { %v1281_v45 = vpop.f32.mrf.mxu1  ;;  %v1648_v5 = vpop.f32.mrf.mxu0 }
 0x13b   :  { %v1167_v4 = vadd.f32 %v1647_v46, %v3112_v34 }
 0x13c   :  { %v1282_v55 = vpop.f32.mrf.mxu1  ;;  %v1649_v20 = vpop.f32.mrf.mxu0 }
 0x13d   :  { %v1280_v17 = vadd.f32 %v1279_v28, %v1167_v4  ;;  %v1650_v9 = vadd.f32 %v1649_v20, %v1648_v5 }
 0x13e   :  { %v1284_v53 = vpop.f32.mrf.mxu1  ;;  %v1651_v25 = vpop.f32.mrf.mxu0 }
 0x13f   :  { %1359 = vst.msk [vmem:[%s3255_s3] sm:$0xff] %vm1358_vm1, %v1280_v17  ;;  %v1170_v10 = vadd.f32 %v1650_v9, %v3114_v42 }
 0x140   :  { %v1287_v23 = vpop.f32.mrf.mxu1  ;;  %v1652_v24 = vpop.f32.mrf.mxu0 }
 0x141   :  { %v1283_v33 = vadd.f32 %v1282_v55, %v1170_v10  ;;  %v1653_v27 = vadd.f32 %v1652_v24, %v1651_v25 }
 0x142   :  { %v1289_v15 = vpop.f32.mrf.mxu1  ;;  %v1654_v34 = vpop.f32.mrf.mxu0 }
 0x143   :  { %1360 = vst.msk [vmem:[%s3255_s3 + $0x8] sm:$0xff] %vm1358_vm1, %v1283_v33  ;;  %v1175_v16 = vadd.f32 %v1653_v27, %v3116_v8 }
 0x144   :  { %v1290_v29 = vpop.f32.mrf.mxu1  ;;  %v1655_v19 = vpop.f32.mrf.mxu0 }
 0x145   :  { %v1288_v2 = vadd.f32 %v1287_v23, %v1175_v16  ;;  %v1656_v21 = vadd.f32 %v1655_v19, %v1654_v34 }
 0x146   :  { %v1292_v35 = vpop.f32.mrf.mxu1  ;;  %v1657_v31 = vpop.f32.mrf.mxu0 }
 0x147   :  { %1361 = vst.msk [vmem:[%s3255_s3 + $0x10] sm:$0xff] %vm1358_vm1, %v1288_v2  ;;  %v1178_v42 = vadd.f32 %v1656_v21, %v3118_v3 }
 0x148   :  { %v1295_v49 = vpop.f32.mrf.mxu1  ;;  %v1658_v43 = vpop.f32.mrf.mxu0 }
 0x149   :  { %v1291_v48 = vadd.f32 %v1290_v29, %v1178_v42  ;;  %v1659_v26 = vadd.f32 %v1658_v43, %v1657_v31 }
 0x14a   :  { %v1297_v57 = vpop.f32.mrf.mxu1  ;;  %v1660_v7 = vpop.f32.mrf.mxu0 }
 0x14b   :  { %1362 = vst.msk [vmem:[%s3255_s3 + $0x18] sm:$0xff] %vm1358_vm1, %v1291_v48  ;;  %v1183_v8 = vadd.f32 %v1659_v26, %v3120_v6 }
 0x14c   :  { %v1298_v39 = vpop.f32.mrf.mxu1  ;;  %v1661_v50 = vpop.f32.mrf.mxu0 }
 0x14d   :  { %v1296_v51 = vadd.f32 %v1295_v49, %v1183_v8  ;;  %v1662_v59 = vadd.f32 %v1661_v50, %v1660_v7 }
 0x14e   :  { %v1300_v44 = vpop.f32.mrf.mxu1  ;;  %v1663_v13 = vpop.f32.mrf.mxu0 }
 0x14f   :  { %1363 = vst.msk [vmem:[%s3255_s3 + $0x20] sm:$0xff] %vm1358_vm1, %v1296_v51  ;;  %v1186_v3 = vadd.f32 %v1662_v59, %v3122_v0 }
 0x150   :  { %v1303_v60 = vpop.f32.mrf.mxu1  ;;  %v1664_v32 = vpop.f32.mrf.mxu0 }
 0x151   :  { %v1299_v18 = vadd.f32 %v1298_v39, %v1186_v3  ;;  %v1665_v63 = vadd.f32 %v1664_v32, %v1663_v13 }
 0x152   :  { %v1305_v36 = vpop.f32.mrf.mxu1  ;;  %v1666_v52 = vpop.f32.mrf.mxu0 }
 0x153   :  { %1364 = vst.msk [vmem:[%s3255_s3 + $0x28] sm:$0xff] %vm1358_vm1, %v1299_v18  ;;  %v1191_v6 = vadd.f32 %v1665_v63, %v3124_v58 }
 0x154   :  { %v1306_v54 = vpop.f32.mrf.mxu1  ;;  %v1667_v28 = vpop.f32.mrf.mxu0 }
 0x155   :  { %v1304_v22 = vadd.f32 %v1303_v60, %v1191_v6  ;;  %v1668_v46 = vadd.f32 %v1667_v28, %v1666_v52 }
 0x156   :  { %v1308_v45 = vpop.f32.mrf.mxu1  ;;  %v1669_v5 = vpop.f32.mrf.mxu0 }
 0x157   :  { %1365 = vst.msk [vmem:[%s3255_s3 + $0x30] sm:$0xff] %vm1358_vm1, %v1304_v22  ;;  %v1194_v0 = vadd.f32 %v1668_v46, %v3126_v56 }
 0x158   :  { %v1311_v4 = vpop.f32.mrf.mxu1  ;;  %v1670_v55 = vpop.f32.mrf.mxu0 }
 0x159   :  { %v1307_v20 = vadd.f32 %v1306_v54, %v1194_v0  ;;  %v1671_v17 = vadd.f32 %v1670_v55, %v1669_v5 }
 0x15a   :  { %v1313_v9 = vpop.f32.mrf.mxu1  ;;  %v1672_v53 = vpop.f32.mrf.mxu0 }
 0x15b   :  { %1366 = vst.msk [vmem:[%s3255_s3 + $0x38] sm:$0xff] %vm1358_vm1, %v1307_v20  ;;  %v1199_v58 = vadd.f32 %v1671_v17, %v3128_v61 }
 0x15c   :  { %v1314_v25 = vpop.f32.mrf.mxu1  ;;  %v1673_v10 = vpop.f32.mrf.mxu0 }
 0x15d   :  { %v1312_v23 = vadd.f32 %v1311_v4, %v1199_v58  ;;  %v1674_v24 = vadd.f32 %v1673_v10, %v1672_v53 }
 0x15e   :  { %v1316_v33 = vpop.f32.mrf.mxu1  ;;  %v1675_v27 = vpop.f32.mrf.mxu0 }
 0x15f   :  { %1367 = vst.msk [vmem:[%s3255_s3 + $0x40] sm:$0xff] %vm1358_vm1, %v1312_v23  ;;  %v1202_v56 = vadd.f32 %v1674_v24, %v3130_v40 }
 0x160   :  { %v1319_v15 = vpop.f32.mrf.mxu1  ;;  %v1676_v34 = vpop.f32.mrf.mxu0 }
 0x161   :  { %v1315_v16 = vadd.f32 %v1314_v25, %v1202_v56  ;;  %v1677_v29 = vadd.f32 %v1676_v34, %v1675_v27 }
 0x162   :  { %v1321_v19 = vpop.f32.mrf.mxu1  ;;  %v1678_v2 = vpop.f32.mrf.mxu0 }
 0x163   :  { %1368 = vst.msk [vmem:[%s3255_s3 + $0x48] sm:$0xff] %vm1358_vm1, %v1315_v16  ;;  %v1207_v61 = vadd.f32 %v1677_v29, %v3132_v14 }
 0x164   :  { %v1322_v21 = vpop.f32.mrf.mxu1  ;;  %v1679_v35 = vpop.f32.mrf.mxu0 }
 0x165   :  { %v1320_v31 = vadd.f32 %v1319_v15, %v1207_v61  ;;  %v1680_v42 = vadd.f32 %v1679_v35, %v1678_v2 }
 0x166   :  { %v1324_v49 = vpop.f32.mrf.mxu1  ;;  %v1681_v43 = vpop.f32.mrf.mxu0 }
 0x167   :  { %1369 = vst.msk [vmem:[%s3255_s3 + $0x50] sm:$0xff] %vm1358_vm1, %v1320_v31  ;;  %v1210_v40 = vadd.f32 %v1680_v42, %v3134_v37 }
 0x168   :  { %v1327_v48 = vpop.f32.mrf.mxu1  ;;  %v1682_v26 = vpop.f32.mrf.mxu0 }
 0x169   :  { %v1323_v57 = vadd.f32 %v1322_v21, %v1210_v40  ;;  %v1683_v7 = vadd.f32 %v1682_v26, %v1681_v43 }
 0x16a   :  { %v1329_v8 = vpop.f32.mrf.mxu1  ;;  %v1684_v39 = vpop.f32.mrf.mxu0 }
 0x16b   :  { %1370 = vst.msk [vmem:[%s3255_s3 + $0x58] sm:$0xff] %vm1358_vm1, %v1323_v57  ;;  %v1215_v14 = vadd.f32 %v1683_v7, %v3136_v1 }
 0x16c   :  { %v1330_v50 = vpop.f32.mrf.mxu1  ;;  %v1685_v51 = vpop.f32.mrf.mxu0 }
 0x16d   :  { %v1328_v59 = vadd.f32 %v1327_v48, %v1215_v14  ;;  %v1686_v44 = vadd.f32 %v1685_v51, %v1684_v39 }
 0x16e   :  { %v1332_v13 = vpop.f32.mrf.mxu1  ;;  %v1687_v3 = vpop.f32.mrf.mxu0 }
 0x16f   :  { %1371 = vst.msk [vmem:[%s3255_s3 + $0x60] sm:$0xff] %vm1358_vm1, %v1328_v59  ;;  %v1218_v37 = vadd.f32 %v1686_v44, %v3138_v41 }
 0x170   :  { %v1335_v60 = vpop.f32.mrf.mxu1  ;;  %v1688_v32 = vpop.f32.mrf.mxu0 }
 0x171   :  { %v1331_v18 = vadd.f32 %v1330_v50, %v1218_v37  ;;  %v1689_v63 = vadd.f32 %v1688_v32, %v1687_v3 }
 0x172   :  { %v1337_v36 = vpop.f32.mrf.mxu1  ;;  %v1690_v52 = vpop.f32.mrf.mxu0 }
 0x173   :  { %1372 = vst.msk [vmem:[%s3255_s3 + $0x68] sm:$0xff] %vm1358_vm1, %v1331_v18  ;;  %v1223_v1 = vadd.f32 %v1689_v63, %v3140_v62 }
 0x174   :  { %v1338_v6 = vpop.f32.mrf.mxu1  ;;  %v1691_v54 = vpop.f32.mrf.mxu0 }
 0x175   :  { %v1336_v28 = vadd.f32 %v1335_v60, %v1223_v1  ;;  %v1692_v22 = vadd.f32 %v1691_v54, %v1690_v52 }
 0x176   :  { %v1340_v46 = vpop.f32.mrf.mxu1  ;;  %v1693_v45 = vpop.f32.mrf.mxu0 }
 0x177   :  { %1373 = vst.msk [vmem:[%s3255_s3 + $0x70] sm:$0xff] %vm1358_vm1, %v1336_v28  ;;  %v1226_v41 = vadd.f32 %v1692_v22, %v3142_v47 }
 0x178   :  { %v1343_v5 = vpop.f32.mrf.mxu1  ;;  %v1694_v0 = vpop.f32.mrf.mxu0 }
 0x179   :  { %v1339_v4 = vadd.f32 %v1338_v6, %v1226_v41  ;;  %v1695_v55 = vadd.f32 %v1694_v0, %v1693_v45 }
 0x17a   :  { %v1345_v20 = vpop.f32.mrf.mxu1  ;;  %v1696_v17 = vpop.f32.mrf.mxu0 }
 0x17b   :  { %1374 = vst.msk [vmem:[%s3255_s3 + $0x78] sm:$0xff] %vm1358_vm1, %v1339_v4  ;;  %v1231_v62 = vadd.f32 %v1695_v55, %v3144_v30 }
 0x17c   :  { %v1346_v9 = vpop.f32.mrf.mxu1  ;;  %v1697_v53 = vpop.f32.mrf.mxu0 }
 0x17d   :  { %v1344_v58 = vadd.f32 %v1343_v5, %v1231_v62  ;;  %v1698_v25 = vadd.f32 %v1697_v53, %v1696_v17 }
 0x17e   :  { %v1348_v10 = vpop.f32.mrf.mxu1  ;;  %v1699_v23 = vpop.f32.mrf.mxu0 }
 0x17f   :  { %1375 = vst.msk [vmem:[%s3255_s3 + $0x80] sm:$0xff] %vm1358_vm1, %v1344_v58  ;;  %v1234_v47 = vadd.f32 %v1698_v25, %v3146_v38 }
 0x180   :  { %v1351_v24 = vpop.f32.mrf.mxu1  ;;  %v1700_v33 = vpop.f32.mrf.mxu0 }
 0x181   :  { %v1347_v27 = vadd.f32 %v1346_v9, %v1234_v47  ;;  %v1701_v56 = vadd.f32 %v1700_v33, %v1699_v23 }
 0x182   :  { %v1353_v15 = vpop.f32.mrf.mxu1  ;;  %v1702_v34 = vpop.f32.mrf.mxu0 }
 0x183   :  { %1376 = vst.msk [vmem:[%s3255_s3 + $0x88] sm:$0xff] %vm1358_vm1, %v1347_v27  ;;  %v1239_v30 = vadd.f32 %v1701_v56, %v3148_v12 }
 0x184   :  { %v1354_v16 = vpop.f32.mrf.mxu1  ;;  %v1703_v29 = vpop.f32.mrf.mxu0 }
 0x185   :  { %v1352_v19 = vadd.f32 %v1351_v24, %v1239_v30  ;;  %v1704_v2 = vadd.f32 %v1703_v29, %v1702_v34 }
 0x186   :  { %v1356_v61 = vpop.f32.mrf.mxu1 }
 0x187   :  { %1377 = vst.msk [vmem:[%s3255_s3 + $0x90] sm:$0xff] %vm1358_vm1, %v1352_v19  ;;  %v1242_v38 = vadd.f32 %v1704_v2, %v3150_v11 }
 0x189   :  { %v1355_v21 = vadd.f32 %v1354_v16, %v1242_v38 }
 0x18b   :  { %1378 = vst.msk [vmem:[%s3255_s3 + $0x98] sm:$0xff] %vm1358_vm1, %v1355_v21 }

</bundles_post_ra>
